<compile_context>
chip_gen: v6e
topology: v6e:2x2x1
jax: 0.10.0
libtpu: 0.0.40
codegen_flags: <defaults>
</compile_context>

<pallas_src>
import functools

import jax
import jax.numpy as jnp
import numpy as np
from jax.experimental import pallas as pl
from jax.experimental.pallas import tpu as pltpu

DILATION = 2            # dilation of the residual block's k=3 conv
LANE = 128              # TPU lane width
SUBLANE = 8
TARGET_ROWS = 512       # flattened rows per grid step (MXU fill target)
VMEM_TILE_BUDGET = 40 << 20   # tile-sizing budget; fits v7x 64 MiB with headroom
VMEM_LIMIT_CAP = 56 << 20
FC_RESIDENT_BYTES = 8 << 20   # keep FC fused only if (2x buffered) wfc fits this


def _round_up(x, m):
    return (x + m - 1) // m * m


def _vmem_estimate(tb, seq_len, c8, fp, ncp, fuse_fc):
    """Rough per-step VMEM: 2x-buffered input + resident weights + f32/bf16
    intermediates + output blocks."""
    m = tb * seq_len
    est = 2 * m * c8 * 2                                    # bf16 input blocks
    est += 2 * ((c8 * fp + 4 * fp * fp) * 2 + 3 * fp * 4)   # conv weights/biases
    est += m * fp * 28                                      # activation temps
    if fuse_fc:
        est += 2 * (fp * ncp * 2 + ncp * 4)                 # fc weight/bias
        est += 2 * tb * ncp * 4                             # output blocks
    else:
        est += 2 * tb * fp * 4
    return est + (2 << 20)


def _pick_batch_tile(n, seq_len, c8, fp, ncp, fuse_fc):
    """Rows per grid step: target >=512 flattened rows; cap only by VMEM."""
    tb = max(1, -(-TARGET_ROWS // seq_len))   # cdiv(512, L)
    tb = min(tb, n)
    while tb > 1 and _vmem_estimate(tb, seq_len, c8, fp, ncp, fuse_fc) > VMEM_TILE_BUDGET:
        tb = max(1, tb // 2)
    return tb


def _tlprotcnn_kernel(x_ref, w0_ref, b0_ref, w1_ref, b1_ref, w2_ref, b2_ref,
                      *rest, seq_len, batch_tile, fuse_fc):
    """One grid step processes TB sequences, flattened to (TB*L, C) rows."""
    if fuse_fc:
        wfc_ref, bfc_ref, out_ref = rest
    else:
        (out_ref,) = rest

    d = DILATION
    m = batch_tile * seq_len
    cdt = w0_ref.dtype                                   # compute dtype (bf16)

    x = x_ref[0]                                         # (M, C8) bf16

    # ---- initial 1x1 conv (position-wise, exact on flattened rows) ----
    h0 = jnp.dot(x, w0_ref[...],
                 preferred_element_type=jnp.float32) + b0_ref[...]   # (M, Fp) f32

    # ---- residual block ----
    pre = jnp.maximum(h0, 0.0)                           # ReLU, f32

    # boundary masks, built once per tile from one (M,1) iota (position of each
    # row inside its own sequence; prevents cross-sample leakage of the rolls)
    pos = jax.lax.broadcasted_iota(jnp.int32, (m, 1), 0)
    if batch_tile > 1:
        pos = pos % seq_len
    ok_left = pos >= d
    ok_right = pos < seq_len - d

    # k=3, dilation=d conv: sublane rolls (XLU) + mask, operands cast to bf16,
    # three accumulating MXU matmuls (no lane-axis concat buffer).
    left = jnp.where(ok_left, pltpu.roll(pre, d, axis=0), 0.0).astype(cdt)
    right = jnp.where(ok_right, pltpu.roll(pre, m - d, axis=0), 0.0).astype(cdt)
    mid = pre.astype(cdt)

    c1 = jnp.dot(left, w1_ref[0], preferred_element_type=jnp.float32)
    c1 = c1 + jnp.dot(mid, w1_ref[1], preferred_element_type=jnp.float32)
    c1 = c1 + jnp.dot(right, w1_ref[2], preferred_element_type=jnp.float32)
    c1 = c1 + b1_ref[...]

    r1 = jnp.maximum(c1, 0.0).astype(cdt)
    c2 = jnp.dot(r1, w2_ref[...],
                 preferred_element_type=jnp.float32) + b2_ref[...]
    h = h0 + c2                                          # skip connection, f32

    # ---- global max pool over L per sequence ----
    if seq_len % SUBLANE == 0:
        pooled = jnp.max(h.reshape(batch_tile, seq_len, h.shape[-1]), axis=1)
    else:
        # fallback for unaligned L (layout-relayout slices; demo L is aligned)
        pooled = jnp.concatenate(
            [jnp.max(h[t * seq_len:(t + 1) * seq_len], axis=0, keepdims=True)
             for t in range(batch_tile)], axis=0)        # (TB, Fp) f32

    if fuse_fc:
        logits = jnp.dot(pooled.astype(cdt), wfc_ref[...],
                         preferred_element_type=jnp.float32) + bfc_ref[...]
        out_ref[0] = logits.astype(out_ref.dtype)        # lane-dense (TB, NCp)
    else:
        out_ref[0] = pooled.astype(out_ref.dtype)        # (TB, Fp)


@jax.jit
def tlprotcnn_forward(emb_ncl, params):
    """emb_ncl: [N, EMBSIZE, L] float32 (PyTorch layout). Returns [N, nclasses]."""
    w0, b0, w1, b1, w2, b2, wfc, bfc = params
    n, c, seq_len = emb_ncl.shape
    f = w0.shape[1]
    nclasses = wfc.shape[1]

    c8 = _round_up(c, SUBLANE)       # no 128-lane padding of the input channels
    fp = _round_up(f, LANE)
    ncp = _round_up(nclasses, LANE)

    # Keep the FC fused only when wfc can live in VMEM (not Pfam-scale classes).
    fuse_fc = (2 * fp * ncp * 2) <= FC_RESIDENT_BYTES

    tb = _pick_batch_tile(n, seq_len, c8, fp, ncp, fuse_fc)
    n_pad = _round_up(n, tb)
    nblk = n_pad // tb
    m = tb * seq_len

    cdt = jnp.bfloat16   # MXU operand dtype (accumulation stays f32 in-kernel)

    # NCL -> NLC (channels on lanes), bf16, channels padded only to a sublane
    # multiple; one fused XLA transpose+cast, then blocked per tile.
    # TODO(synk): fold this transpose into the kernel (XLU) to remove the last
    # host-side HBM round trip of the activation.
    x = jnp.transpose(emb_ncl, (0, 2, 1)).astype(cdt)
    x = jnp.pad(x, ((0, n_pad - n), (0, 0), (0, c8 - c)))
    x3d = x.reshape(nblk, m, c8)

    # Lane-pad parameters on the F / nclasses dims only.
    w0p = jnp.pad(w0.astype(cdt), ((0, c8 - c), (0, fp - f)))
    b0p = jnp.pad(b0.astype(jnp.float32), ((0, 0), (0, fp - f)))
    w1p = jnp.pad(w1.astype(cdt), ((0, 0), (0, fp - f), (0, fp - f)))
    b1p = jnp.pad(b1.astype(jnp.float32), ((0, 0), (0, fp - f)))
    w2p = jnp.pad(w2.astype(cdt), ((0, fp - f), (0, fp - f)))
    b2p = jnp.pad(b2.astype(jnp.float32), ((0, 0), (0, fp - f)))

    in_arrays = [x3d, w0p, b0p, w1p, b1p, w2p, b2p]
    in_specs = [
        pl.BlockSpec((1, m, c8), lambda i: (i, 0, 0)),        # x rows (per tile)
        pl.BlockSpec((c8, fp), lambda i: (0, 0)),             # w0 (resident)
        pl.BlockSpec((1, fp), lambda i: (0, 0)),              # b0
        pl.BlockSpec((3, fp, fp), lambda i: (0, 0, 0)),       # w1 (3 taps)
        pl.BlockSpec((1, fp), lambda i: (0, 0)),              # b1
        pl.BlockSpec((fp, fp), lambda i: (0, 0)),             # w2
        pl.BlockSpec((1, fp), lambda i: (0, 0)),              # b2
    ]

    if fuse_fc:
        wfcp = jnp.pad(wfc.astype(cdt), ((0, fp - f), (0, ncp - nclasses)))
        bfcp = jnp.pad(bfc.astype(jnp.float32), ((0, 0), (0, ncp - nclasses)))
        in_arrays += [wfcp, bfcp]
        in_specs += [pl.BlockSpec((fp, ncp), lambda i: (0, 0)),
                     pl.BlockSpec((1, ncp), lambda i: (0, 0))]
        out_cols = ncp
    else:
        out_cols = fp

    est = _vmem_estimate(tb, seq_len, c8, fp, ncp, fuse_fc)
    vmem_limit = int(min(VMEM_LIMIT_CAP, max(32 << 20, int(est * 1.3))))

    out = pl.pallas_call(
        functools.partial(_tlprotcnn_kernel, seq_len=seq_len, batch_tile=tb,
                          fuse_fc=fuse_fc),
        out_shape=jax.ShapeDtypeStruct((nblk, tb, out_cols), jnp.float32),
        grid_spec=pltpu.PrefetchScalarGridSpec(
            num_scalar_prefetch=0,
            grid=(nblk,),
            in_specs=in_specs,
            out_specs=pl.BlockSpec((1, tb, out_cols), lambda i: (i, 0, 0)),
        ),
        compiler_params=pltpu.CompilerParams(
            dimension_semantics=("parallel",),
            vmem_limit_bytes=vmem_limit),
    )(*in_arrays)

    out = out.reshape(n_pad, out_cols)[:n]
    if fuse_fc:
        return out[:, :nclasses]
    # Pfam-scale nclasses: wfc stays out of VMEM; tiny [N, F] FC runs in XLA.
    return out[:, :f] @ wfc + bfc


def tlprotcnn_forward_ref(emb_ncl, params):
    """Pure-JAX f32 reference of the same forward, for correctness checking."""
    w0, b0, w1, b1, w2, b2, wfc, bfc = params
    x = jnp.transpose(emb_ncl, (0, 2, 1)).astype(jnp.float32)   # [N, L, C]
    h0 = jnp.einsum('nlc,cf->nlf', x, w0) + b0
    pre = jax.nn.relu(h0)
    d = DILATION
    N, L, F = pre.shape
    zpad = jnp.zeros((N, d, F), jnp.float32)
    left = jnp.concatenate([zpad, pre[:, :-d]], axis=1)
    right = jnp.concatenate([pre[:, d:], zpad], axis=1)
    c1 = (jnp.einsum('nlf,fg->nlg', left, w1[0])
          + jnp.einsum('nlf,fg->nlg', pre, w1[1])
          + jnp.einsum('nlf,fg->nlg', right, w1[2]) + b1)
    r1 = jax.nn.relu(c1)
    c2 = jnp.einsum('nlf,fg->nlg', r1, w2) + b2
    h = h0 + c2
    pooled = jnp.max(h, axis=1)                                  # [N, F]
    return pooled @ wfc + bfc


def make_params(key, emb_size, nfilters, nclasses):
    ks = jax.random.split(key, 8)
    sc = 0.05
    w0 = sc * jax.random.normal(ks[0], (emb_size, nfilters), jnp.float32)
    b0 = sc * jax.random.normal(ks[1], (1, nfilters), jnp.float32)
    w1 = sc * jax.random.normal(ks[2], (3, nfilters, nfilters), jnp.float32)
    b1 = sc * jax.random.normal(ks[3], (1, nfilters), jnp.float32)
    w2 = sc * jax.random.normal(ks[4], (nfilters, nfilters), jnp.float32)
    b2 = sc * jax.random.normal(ks[5], (1, nfilters), jnp.float32)
    wfc = sc * jax.random.normal(ks[6], (nfilters, nclasses), jnp.float32)
    bfc = sc * jax.random.normal(ks[7], (1, nclasses), jnp.float32)
    return (w0, b0, w1, b1, w2, b2, wfc, bfc)


if __name__ == "__main__":
    # Small, module-consistent shapes: emb is [N, EMBSIZE, L]
    N, EMB, L = 2, 32, 16
    NFILTERS, NCLASSES = 64, 8

    key = jax.random.PRNGKey(0)
    k_x, k_p = jax.random.split(key)
    emb = jax.random.normal(k_x, (N, EMB, L), jnp.float32)
    params = make_params(k_p, EMB, NFILTERS, NCLASSES)

    out = tlprotcnn_forward(emb, params)
    out = jax.block_until_ready(out)

    ref = jax.block_until_ready(tlprotcnn_forward_ref(emb, params))
    # Matmul operands are bf16 (f32 accumulation); expected error ~1e-3.
    np.testing.assert_allclose(np.asarray(out), np.asarray(ref),
                               rtol=2e-2, atol=2e-2)
    print("KERNEL_OK")
</pallas_src>

<mosaic_0001>
module attributes {stable_mosaic.version = 11 : i64} {
  func.func @_tlprotcnn_kernel(%arg0: i32, %arg1: memref<1x32x32xbf16, #tpu.memory_space<vmem>>, %arg2: memref<32x128xbf16, #tpu.memory_space<vmem>>, %arg3: memref<1x128xf32, #tpu.memory_space<vmem>>, %arg4: memref<3x128x128xbf16, #tpu.memory_space<vmem>>, %arg5: memref<1x128xf32, #tpu.memory_space<vmem>>, %arg6: memref<128x128xbf16, #tpu.memory_space<vmem>>, %arg7: memref<1x128xf32, #tpu.memory_space<vmem>>, %arg8: memref<128x128xbf16, #tpu.memory_space<vmem>>, %arg9: memref<1x128xf32, #tpu.memory_space<vmem>>, %arg10: memref<1x2x128xf32, #tpu.memory_space<vmem>>) attributes {dimension_semantics = [#tpu.dimension_semantics<parallel>], iteration_bounds = array<i64: 1>, scalar_prefetch = 0 : i64, scratch_operands = 0 : i64, tpu.core_type = #tpu.core_type<tc>, window_params = [{transform_indices = @transform_0, window_bounds = array<i64: 1, 32, 32>}, {pipeline_mode = #tpu.pipeline_mode<synchronous>, transform_indices = @transform_1, window_bounds = array<i64: 32, 128>}, {pipeline_mode = #tpu.pipeline_mode<synchronous>, transform_indices = @transform_2, window_bounds = array<i64: 1, 128>}, {pipeline_mode = #tpu.pipeline_mode<synchronous>, transform_indices = @transform_3, window_bounds = array<i64: 3, 128, 128>}, {pipeline_mode = #tpu.pipeline_mode<synchronous>, transform_indices = @transform_4, window_bounds = array<i64: 1, 128>}, {pipeline_mode = #tpu.pipeline_mode<synchronous>, transform_indices = @transform_5, window_bounds = array<i64: 128, 128>}, {pipeline_mode = #tpu.pipeline_mode<synchronous>, transform_indices = @transform_6, window_bounds = array<i64: 1, 128>}, {pipeline_mode = #tpu.pipeline_mode<synchronous>, transform_indices = @transform_7, window_bounds = array<i64: 128, 128>}, {pipeline_mode = #tpu.pipeline_mode<synchronous>, transform_indices = @transform_8, window_bounds = array<i64: 1, 128>}, {transform_indices = @transform_9, window_bounds = array<i64: 1, 2, 128>}]} {
    %c0 = arith.constant 0 : index
    %c0_0 = arith.constant 0 : index
    %c0_1 = arith.constant 0 : index
    %0 = vector.load %arg1[%c0, %c0_0, %c0_1] : memref<1x32x32xbf16, #tpu.memory_space<vmem>>, vector<1x32x32xbf16>
    %1 = vector.shape_cast %0 : vector<1x32x32xbf16> to vector<32x32xbf16>
    %c0_2 = arith.constant 0 : index
    %c0_3 = arith.constant 0 : index
    %2 = vector.load %arg2[%c0_2, %c0_3] : memref<32x128xbf16, #tpu.memory_space<vmem>>, vector<32x128xbf16>
    %cst = arith.constant dense<0.000000e+00> : vector<32x128xf32>
    %3 = tpu.matmul %1, %2, %cst {dimension_numbers = #tpu.dot_dimension_numbers<[1], [0], [0], [1], [0, 0, 1, 1], [], []>} : vector<32x32xbf16>, vector<32x128xbf16>, vector<32x128xf32> -> vector<32x128xf32>
    %c0_4 = arith.constant 0 : index
    %c0_5 = arith.constant 0 : index
    %4 = vector.load %arg3[%c0_4, %c0_5] : memref<1x128xf32, #tpu.memory_space<vmem>>, vector<1x128xf32>
    %5 = vector.broadcast %4 : vector<1x128xf32> to vector<32x128xf32>
    %6 = arith.addf %3, %5 : vector<32x128xf32>
    %cst_6 = arith.constant 0.000000e+00 : f32
    %7 = vector.broadcast %cst_6 : f32 to vector<32x128xf32>
    %8 = arith.maximumf %6, %7 : vector<32x128xf32>
    %9 = tpu.iota {dimensions = array<i32: 0>} : vector<32x1xi32>
    %c16_i32 = arith.constant 16 : i32
    %c0_i32 = arith.constant 0 : i32
    %10 = arith.cmpi eq, %c16_i32, %c0_i32 : i32
    %c1_i32 = arith.constant 1 : i32
    %11 = arith.select %10, %c1_i32, %c16_i32 : i32
    %12 = vector.broadcast %11 : i32 to vector<32x1xi32>
    %13 = arith.remsi %9, %12 : vector<32x1xi32>
    %c0_i32_7 = arith.constant 0 : i32
    %14 = vector.broadcast %c0_i32_7 : i32 to vector<32x1xi32>
    %15 = arith.cmpi ne, %13, %14 : vector<32x1xi32>
    %c0_i32_8 = arith.constant 0 : i32
    %16 = vector.broadcast %c0_i32_8 : i32 to vector<32x1xi32>
    %17 = arith.cmpi slt, %13, %16 : vector<32x1xi32>
    %c0_i32_9 = arith.constant 0 : i32
    %18 = arith.cmpi slt, %11, %c0_i32_9 : i32
    %19 = vector.broadcast %18 : i1 to vector<32x1xi1>
    %20 = vector.broadcast %19 : vector<32x1xi1> to vector<32x1xi1>
    %21 = arith.xori %17, %20 : vector<32x1xi1>
    %22 = arith.andi %21, %15 : vector<32x1xi1>
    %23 = vector.broadcast %11 : i32 to vector<32x1xi32>
    %24 = arith.addi %13, %23 : vector<32x1xi32>
    %25 = arith.select %22, %24, %13 : vector<32x1xi1>, vector<32x1xi32>
    %c2_i32 = arith.constant 2 : i32
    %26 = vector.broadcast %c2_i32 : i32 to vector<32x1xi32>
    %27 = arith.cmpi sge, %25, %26 : vector<32x1xi32>
    %c14_i32 = arith.constant 14 : i32
    %28 = vector.broadcast %c14_i32 : i32 to vector<32x1xi32>
    %29 = arith.cmpi slt, %25, %28 : vector<32x1xi32>
    %c2_i32_10 = arith.constant 2 : i32
    %30 = tpu.dynamic_rotate %8 by %c2_i32_10 dim 0 : vector<32x128xf32>, i32 -> vector<32x128xf32>
    %cst_11 = arith.constant 0.000000e+00 : f32
    %31 = vector.shape_cast %27 : vector<32x1xi1> to vector<32x1xi1>
    %32 = vector.broadcast %31 : vector<32x1xi1> to vector<32x128xi1>
    %33 = vector.broadcast %cst_11 : f32 to vector<32x128xf32>
    %34 = arith.select %32, %30, %33 : vector<32x128xi1>, vector<32x128xf32>
    %35 = arith.truncf %34 : vector<32x128xf32> to vector<32x128xbf16>
    %c30_i32 = arith.constant 30 : i32
    %36 = tpu.dynamic_rotate %8 by %c30_i32 dim 0 : vector<32x128xf32>, i32 -> vector<32x128xf32>
    %cst_12 = arith.constant 0.000000e+00 : f32
    %37 = vector.shape_cast %29 : vector<32x1xi1> to vector<32x1xi1>
    %38 = vector.broadcast %37 : vector<32x1xi1> to vector<32x128xi1>
    %39 = vector.broadcast %cst_12 : f32 to vector<32x128xf32>
    %40 = arith.select %38, %36, %39 : vector<32x128xi1>, vector<32x128xf32>
    %41 = arith.truncf %40 : vector<32x128xf32> to vector<32x128xbf16>
    %42 = arith.truncf %8 : vector<32x128xf32> to vector<32x128xbf16>
    %c0_13 = arith.constant 0 : index
    %c0_14 = arith.constant 0 : index
    %c0_15 = arith.constant 0 : index
    %43 = vector.load %arg4[%c0_13, %c0_14, %c0_15] : memref<3x128x128xbf16, #tpu.memory_space<vmem>>, vector<1x128x128xbf16>
    %44 = vector.shape_cast %43 : vector<1x128x128xbf16> to vector<128x128xbf16>
    %cst_16 = arith.constant dense<0.000000e+00> : vector<32x128xf32>
    %45 = tpu.matmul %35, %44, %cst_16 {dimension_numbers = #tpu.dot_dimension_numbers<[1], [0], [0], [1], [0, 0, 1, 1], [], []>} : vector<32x128xbf16>, vector<128x128xbf16>, vector<32x128xf32> -> vector<32x128xf32>
    %c1 = arith.constant 1 : index
    %c0_17 = arith.constant 0 : index
    %c0_18 = arith.constant 0 : index
    %46 = vector.load %arg4[%c1, %c0_17, %c0_18] : memref<3x128x128xbf16, #tpu.memory_space<vmem>>, vector<1x128x128xbf16>
    %47 = vector.shape_cast %46 : vector<1x128x128xbf16> to vector<128x128xbf16>
    %cst_19 = arith.constant dense<0.000000e+00> : vector<32x128xf32>
    %48 = tpu.matmul %42, %47, %cst_19 {dimension_numbers = #tpu.dot_dimension_numbers<[1], [0], [0], [1], [0, 0, 1, 1], [], []>} : vector<32x128xbf16>, vector<128x128xbf16>, vector<32x128xf32> -> vector<32x128xf32>
    %49 = arith.addf %45, %48 : vector<32x128xf32>
    %c2 = arith.constant 2 : index
    %c0_20 = arith.constant 0 : index
    %c0_21 = arith.constant 0 : index
    %50 = vector.load %arg4[%c2, %c0_20, %c0_21] : memref<3x128x128xbf16, #tpu.memory_space<vmem>>, vector<1x128x128xbf16>
    %51 = vector.shape_cast %50 : vector<1x128x128xbf16> to vector<128x128xbf16>
    %cst_22 = arith.constant dense<0.000000e+00> : vector<32x128xf32>
    %52 = tpu.matmul %41, %51, %cst_22 {dimension_numbers = #tpu.dot_dimension_numbers<[1], [0], [0], [1], [0, 0, 1, 1], [], []>} : vector<32x128xbf16>, vector<128x128xbf16>, vector<32x128xf32> -> vector<32x128xf32>
    %53 = arith.addf %49, %52 : vector<32x128xf32>
    %c0_23 = arith.constant 0 : index
    %c0_24 = arith.constant 0 : index
    %54 = vector.load %arg5[%c0_23, %c0_24] : memref<1x128xf32, #tpu.memory_space<vmem>>, vector<1x128xf32>
    %55 = vector.broadcast %54 : vector<1x128xf32> to vector<32x128xf32>
    %56 = arith.addf %53, %55 : vector<32x128xf32>
    %cst_25 = arith.constant 0.000000e+00 : f32
    %57 = vector.broadcast %cst_25 : f32 to vector<32x128xf32>
    %58 = arith.maximumf %56, %57 : vector<32x128xf32>
    %59 = arith.truncf %58 : vector<32x128xf32> to vector<32x128xbf16>
    %c0_26 = arith.constant 0 : index
    %c0_27 = arith.constant 0 : index
    %60 = vector.load %arg6[%c0_26, %c0_27] : memref<128x128xbf16, #tpu.memory_space<vmem>>, vector<128x128xbf16>
    %cst_28 = arith.constant dense<0.000000e+00> : vector<32x128xf32>
    %61 = tpu.matmul %59, %60, %cst_28 {dimension_numbers = #tpu.dot_dimension_numbers<[1], [0], [0], [1], [0, 0, 1, 1], [], []>} : vector<32x128xbf16>, vector<128x128xbf16>, vector<32x128xf32> -> vector<32x128xf32>
    %c0_29 = arith.constant 0 : index
    %c0_30 = arith.constant 0 : index
    %62 = vector.load %arg7[%c0_29, %c0_30] : memref<1x128xf32, #tpu.memory_space<vmem>>, vector<1x128xf32>
    %63 = vector.broadcast %62 : vector<1x128xf32> to vector<32x128xf32>
    %64 = arith.addf %61, %63 : vector<32x128xf32>
    %65 = arith.addf %6, %64 : vector<32x128xf32>
    %66 = vector.shape_cast %65 : vector<32x128xf32> to vector<2x16x128xf32>
    %cst_31 = arith.constant dense<0xFF800000> : vector<2x128xf32>
    %67 = vector.multi_reduction <maximumf>, %66, %cst_31 [1] : vector<2x16x128xf32> to vector<2x128xf32>
    %68 = arith.truncf %67 : vector<2x128xf32> to vector<2x128xbf16>
    %c0_32 = arith.constant 0 : index
    %c0_33 = arith.constant 0 : index
    %69 = vector.load %arg8[%c0_32, %c0_33] : memref<128x128xbf16, #tpu.memory_space<vmem>>, vector<128x128xbf16>
    %cst_34 = arith.constant dense<0.000000e+00> : vector<2x128xf32>
    %70 = tpu.matmul %68, %69, %cst_34 {dimension_numbers = #tpu.dot_dimension_numbers<[1], [0], [0], [1], [0, 0, 1, 1], [], []>} : vector<2x128xbf16>, vector<128x128xbf16>, vector<2x128xf32> -> vector<2x128xf32>
    %c0_35 = arith.constant 0 : index
    %c0_36 = arith.constant 0 : index
    %71 = vector.load %arg9[%c0_35, %c0_36] : memref<1x128xf32, #tpu.memory_space<vmem>>, vector<1x128xf32>
    %72 = vector.broadcast %71 : vector<1x128xf32> to vector<2x128xf32>
    %73 = arith.addf %70, %72 : vector<2x128xf32>
    %c0_37 = arith.constant 0 : index
    %c0_38 = arith.constant 0 : index
    %c0_39 = arith.constant 0 : index
    %74 = vector.load %arg10[%c0_37, %c0_38, %c0_39] : memref<1x2x128xf32, #tpu.memory_space<vmem>>, vector<1x2x128xf32>
    %75 = vector.shape_cast %74 : vector<1x2x128xf32> to vector<2x128xf32>
    %76 = vector.shape_cast %73 : vector<2x128xf32> to vector<1x2x128xf32>
    tpu.vector_store %arg10[%c0_37, %c0_38, %c0_39], %76 {strides = array<i32>} : memref<1x2x128xf32, #tpu.memory_space<vmem>>, vector<1x2x128xf32>,
    return
  }
  func.func @transform_0(%arg0: i32) -> (i32, i32, i32) {
    %c0_i32 = arith.constant 0 : i32
    %c0_i32_0 = arith.constant 0 : i32
    %c0_i32_1 = arith.constant 0 : i32
    return %arg0, %c0_i32, %c0_i32_0 : i32, i32, i32
  }
  func.func @transform_1(%arg0: i32) -> (i32, i32) {
    %c0_i32 = arith.constant 0 : i32
    %c0_i32_0 = arith.constant 0 : i32
    %c0_i32_1 = arith.constant 0 : i32
    return %c0_i32, %c0_i32_0 : i32, i32
  }
  func.func @transform_2(%arg0: i32) -> (i32, i32) {
    %c0_i32 = arith.constant 0 : i32
    %c0_i32_0 = arith.constant 0 : i32
    %c0_i32_1 = arith.constant 0 : i32
    return %c0_i32, %c0_i32_0 : i32, i32
  }
  func.func @transform_3(%arg0: i32) -> (i32, i32, i32) {
    %c0_i32 = arith.constant 0 : i32
    %c0_i32_0 = arith.constant 0 : i32
    %c0_i32_1 = arith.constant 0 : i32
    %c0_i32_2 = arith.constant 0 : i32
    return %c0_i32, %c0_i32_0, %c0_i32_1 : i32, i32, i32
  }
  func.func @transform_4(%arg0: i32) -> (i32, i32) {
    %c0_i32 = arith.constant 0 : i32
    %c0_i32_0 = arith.constant 0 : i32
    %c0_i32_1 = arith.constant 0 : i32
    return %c0_i32, %c0_i32_0 : i32, i32
  }
  func.func @transform_5(%arg0: i32) -> (i32, i32) {
    %c0_i32 = arith.constant 0 : i32
    %c0_i32_0 = arith.constant 0 : i32
    %c0_i32_1 = arith.constant 0 : i32
    return %c0_i32, %c0_i32_0 : i32, i32
  }
  func.func @transform_6(%arg0: i32) -> (i32, i32) {
    %c0_i32 = arith.constant 0 : i32
    %c0_i32_0 = arith.constant 0 : i32
    %c0_i32_1 = arith.constant 0 : i32
    return %c0_i32, %c0_i32_0 : i32, i32
  }
  func.func @transform_7(%arg0: i32) -> (i32, i32) {
    %c0_i32 = arith.constant 0 : i32
    %c0_i32_0 = arith.constant 0 : i32
    %c0_i32_1 = arith.constant 0 : i32
    return %c0_i32, %c0_i32_0 : i32, i32
  }
  func.func @transform_8(%arg0: i32) -> (i32, i32) {
    %c0_i32 = arith.constant 0 : i32
    %c0_i32_0 = arith.constant 0 : i32
    %c0_i32_1 = arith.constant 0 : i32
    return %c0_i32, %c0_i32_0 : i32, i32
  }
  func.func @transform_9(%arg0: i32) -> (i32, i32, i32) {
    %c0_i32 = arith.constant 0 : i32
    %c0_i32_0 = arith.constant 0 : i32
    %c0_i32_1 = arith.constant 0 : i32
    return %arg0, %c0_i32, %c0_i32_0 : i32, i32, i32
  }
}

</mosaic_0001>

<bundles_post_ra>
// kernel: tlprotcnn_forward.1
= control target key start
LH: loop header
LB: loop body
LE: loop exit
PB: predicated region body
PF: predicated region fallthrough
CT: control target
= control target key end

     0   :  { %vm71_vm0 = vcmask 261120   ;;  %s1481_s0 = inlined_call_operand.vmem [shape: bf16[1,32,32], index: 0, kind: input, shape index: {}]   ;;  %s1482_s1 = inlined_call_operand.vmem [shape: bf16[32,128], index: 1, kind: input, shape index: {}]   ;;  %s1483_s2 = inlined_call_operand.vmem [shape: f32[1,128], index: 2, kind: input, shape index: {}]   ;;  %s1484_s3 = inlined_call_operand.vmem [shape: bf16[3,128,128], index: 3, kind: input, shape index: {}]   ;;  %s1485_s4 = inlined_call_operand.vmem [shape: f32[1,128], index: 4, kind: input, shape index: {}]   ;;  %s1486_s5 = inlined_call_operand.vmem [shape: bf16[128,128], index: 5, kind: input, shape index: {}]   ;;  %s1487_s6 = inlined_call_operand.vmem [shape: f32[1,128], index: 6, kind: input, shape index: {}]   ;;  %s1488_s7 = inlined_call_operand.vmem [shape: bf16[128,128], index: 7, kind: input, shape index: {}]   ;;  %s1489_s8 = inlined_call_operand.vmem [shape: f32[1,128], index: 8, kind: input, shape index: {}]   ;;  %s1490_s9 = inlined_call_operand.hbm [shape: f32[1,2,128], index: 9, kind: output, shape index: {}]  }
   0x1   :  { %v1135_v0 = vld [vmem:[%s1482_s1 + $0x8] sm:$0xff]   ;;  %v1136_v1 = vld [vmem:[%s1482_s1] sm:$0xff]   ;;  %v1139_v4 = vld [vmem:[%s1484_s3 + $0x78] sm:$0xff]  }
   0x2   :  { %1023 = vmatprep.subr.bf16.mxu0 %v1135_v0  ;;  %v1137_v2 = vld [vmem:[%s1481_s0] sm:$0xff]   ;;  %v1138_v3 = vld [vmem:[%s1481_s0 + $0x8] sm:$0xff]   ;;  %v1140_v5 = vld [vmem:[%s1484_s3 + $0x70] sm:$0xff]   ;;  %1031 = vmatprep.subr.bf16.mxu1 %v1139_v4 }
   0x3   :  { %1024 = vmatpush3.bf16.msra.mxu0 %v1135_v0  ;;  %1027 = vmatprep.mubr.msk.bf16.mxu0 %vm71_vm0, %v1137_v2  ;;  %v1141_v6 = vld [vmem:[%s1484_s3 + $0x38] sm:$0xff]   ;;  %v1142_v7 = vld [vmem:[%s1484_s3 + $0x68] sm:$0xff]   ;;  %v1143_v8 = vld [vmem:[%s1484_s3 + $0x30] sm:$0xff]  }
   0x4   :  { %1025 = vmatprep.subr.bf16.mxu0 %v1136_v1  ;;  %1032 = vmatpush3.bf16.msra.mxu1 %v1139_v4  ;;  %v1144_v9 = vld [vmem:[%s1484_s3 + $0x60] sm:$0xff]   ;;  %v1145_v10 = vld [vmem:[%s1484_s3 + $0x28] sm:$0xff]   ;;  %v1146_v11 = vld [vmem:[%s1484_s3 + $0x58] sm:$0xff]  }
   0x5   :  { %1033 = vmatprep.subr.bf16.mxu1 %v1140_v5  ;;  %v1147_v12 = vld [vmem:[%s1484_s3 + $0x20] sm:$0xff]  }
   0x7   :  { %1026 = vmatpush3.bf16.msra.mxu0 %v1136_v1 }
   0x8   :  { %1051 = vmatprep.subr.bf16.mxu0 %v1141_v6  ;;  %1034 = vmatpush3.bf16.msra.mxu1 %v1140_v5 }
   0x9   :  { %1035 = vmatprep.subr.bf16.mxu1 %v1142_v7 }
   0xa   :  { %1028 = vmatmul.mubr.msk.bf16.vlgmr.msra.gmra.mxu0 %vm71_vm0, %v1138_v3 }
   0xb   :  { %1052 = vmatpush3.bf16.msra.mxu0 %v1141_v6 }
   0xc   :  { %1053 = vmatprep.subr.bf16.mxu0 %v1143_v8  ;;  %1036 = vmatpush3.bf16.msra.mxu1 %v1142_v7 }
   0xd   :  { %1037 = vmatprep.subr.bf16.mxu1 %v1144_v9 }
   0xf   :  { %1054 = vmatpush3.bf16.msra.mxu0 %v1143_v8 }
  0x10   :  { %1055 = vmatprep.subr.bf16.mxu0 %v1145_v10  ;;  %1038 = vmatpush3.bf16.msra.mxu1 %v1144_v9 }
  0x11   :  { %1039 = vmatprep.subr.bf16.mxu1 %v1146_v11 }
  0x13   :  { %1056 = vmatpush3.bf16.msra.mxu0 %v1145_v10 }
  0x14   :  { %1057 = vmatprep.subr.bf16.mxu0 %v1147_v12  ;;  %1040 = vmatpush3.bf16.msra.mxu1 %v1146_v11 }
  0x17   :  { %1058 = vmatpush3.bf16.msra.mxu0 %v1147_v12 }
  0x18   :  { %14 = vsyncpa [#allocation3], 0  ;;  %v1148_v13 = vld [vmem:[%s1484_s3 + $0x50] sm:$0xff]   ;;  %v1149_v14 = vld [vmem:[%s1484_s3 + $0x18] sm:$0xff]   ;;  %v131_v21 = vlaneseq  ;;  %vm1201_vm6 = vmmov 1   ;;  %vm1203_vm12 = vmmov 0  }
  0x19   :  { %1041 = vmatprep.subr.bf16.mxu1 %v1148_v13  ;;  %1059 = vmatprep.subr.bf16.mxu0 %v1149_v14  ;;  %v1150_v15 = vld [vmem:[%s1484_s3 + $0x48] sm:$0xff]   ;;  %v1151_v16 = vld [vmem:[%s1484_s3 + $0x10] sm:$0xff]   ;;  %v1152_v17 = vld [vmem:[%s1484_s3 + $0x40] sm:$0xff]   ;;  %vm769_vm13 = vcmask 1041409   ;;  %s1204_s26 = smov [#allocation2]  }
  0x1a   :  { %1042 = vmatpush3.bf16.msra.mxu1 %v1148_v13  ;;  %v1153_v18 = vld [vmem:[%s1484_s3 + $0x8] sm:$0xff]   ;;  %v1154_v19 = vld [vmem:[%s1484_s3] sm:$0xff]   ;;  %v1155_v20 = vld [vmem:[%s1484_s3 + $0xb8] sm:$0xff]   ;;  %v1320_v22 = vshrl.u32 %v131_v21, 7  ;;  %s868_s27 = sshll.u32 %s1204_s26, 4  ;;  %s869_s27 = int_to_ptr.vmem [resolvable:$true] %s868_s27 }
  0x1b   :  { %1060 = vmatpush3.bf16.msra.mxu0 %v1149_v14  ;;  %1043 = vmatprep.subr.bf16.mxu1 %v1150_v15  ;;  %v876_v24 = vld [vmem:[%s1483_s2] ss:$0 sm:$0xff]  ;;  %v1156_v61 = vld [vmem:[%s1484_s3 + $0xb0] sm:$0xff]   ;;  %v1157_v63 = vld [vmem:[%s1484_s3 + $0xa8] sm:$0xff]   ;;  %s1179_s2 = scalar_lea.vmem %s869_s27, 32  ;;  %p1184_p1 = scmp.lt.s32.totalorder %s869_s27, %s869_s27 }
  0x1c   :  { %1061 = vmatprep.subr.bf16.mxu0 %v1151_v16  ;;  %v133_v26 = vadd.s32 8, %v1320_v22  ;;  %v134_v27 = vadd.s32 16, %v1320_v22  ;;  %v140_v32 = vand.u32 15, %v1320_v22  ;;  %vm196_vm2 = vcmp.lt.s32.totalorder %v1320_v22, 2  ;;  %v1158_v0 = vld [vmem:[%s1484_s3 + $0xa0] sm:$0xff]   ;;  %v1159_v1 = vld [vmem:[%s1484_s3 + $0x98] sm:$0xff]   ;;  %p1180_p0 = scmp.ne.s32.totalorder %s869_s27, %s1179_s2  ;;  %p1185_p2 = scmp.lt.s32.totalorder %s1179_s2, %s1179_s2 }
  0x1d   :  { %vm219_vm3 = vcmp.lt.s32.totalorder %v1320_v22, 6  ;;  %v1160_v2 = vld [vmem:[%s1484_s3 + $0x90] sm:$0xff]   ;;  %v1161_v3 = vld [vmem:[%s1484_s3 + $0x88] sm:$0xff]   ;;  %v135_v4 = vadd.s32 24, %v1320_v22  ;;  %v1162_v5 = vld [vmem:[%s1484_s3 + $0x80] sm:$0xff]  }
  0x1e   :  { %1044 = vmatpush3.bf16.msra.mxu1 %v1150_v15  ;;  %v147_v34 = vand.u32 15, %v133_v26  ;;  %v154_v35 = vand.u32 15, %v134_v27  ;;  %vm184_vm1 = vcmp.ge.s32.totalorder %v140_v32, 2  ;;  %v1163_v11 = vld [vmem:[%s1486_s5 + $0x38] sm:$0xff]   ;;  %v1164_v12 = vld [vmem:[%s1486_s5 + $0x30] sm:$0xff]   ;;  %v1165_v13 = vld [vmem:[%s1486_s5 + $0x28] sm:$0xff]   ;;  %p1186_p3 = por %p1185_p2, %p1184_p1 }
  0x1f   :  { %1062 = vmatpush3.bf16.msra.mxu0 %v1151_v16  ;;  %1045 = vmatprep.subr.bf16.mxu1 %v1152_v17  ;;  %vm1365_vm7 = vmpackc.low %vm1201_vm6, %vm184_vm1  ;;  %v161_v6 = vand.u32 15, %v135_v4  ;;  %v1166_v14 = vld [vmem:[%s1486_s5 + $0x20] sm:$0xff]   ;;  %v1167_v15 = vld [vmem:[%s1486_s5 + $0x18] sm:$0xff]  }
  0x20   :  { %1063 = vmatprep.subr.bf16.mxu0 %v1153_v18  ;;  %vm1349_vm4 = vcmp.lt.s32.totalorder %v147_v34, 14  ;;  %vm1353_vm5 = vcmp.ge.s32.totalorder %v154_v35, 2  ;;  %v1168_v16 = vld [vmem:[%s1486_s5 + $0x10] sm:$0xff]   ;;  %p1187_p4 = pnand %p1186_p3, %p1180_p0 }
  0x21   :  { %vm945_vm8 = vmpackc.low %vm1349_vm4, %vm1201_vm6  ;;  %vm191_vm10 = vcmp.lt.s32.totalorder %v161_v6, 14 }
  0x22   :  { %1046 = vmatpush3.bf16.msra.mxu1 %v1152_v17  ;;  %vm918_vm9 = vmpackc.low %vm1201_vm6, %vm1353_vm5  ;;  %v1169_v17 = vld [vmem:[%s1486_s5 + $0x8] sm:$0xff]  }
  0x23   :  { %1064 = vmatpush3.bf16.msra.mxu0 %v1153_v18  ;;  %1071 = vmatprep.subr.bf16.mxu1 %v1155_v20  ;;  %vm948_vm11 = vmpackc.low %vm191_vm10, %vm1201_vm6  ;;  %v1170_v18 = vld [vmem:[%s1486_s5] sm:$0xff]  }
  0x24   :  { %1065 = vmatprep.subr.bf16.mxu0 %v1154_v19 }
  0x27   :  { %1066 = vmatpush3.bf16.msra.mxu0 %v1154_v19 }
  0x28   :  { %1091 = vmatprep.subr.bf16.mxu0 %v1163_v11 }
  0xca   :  { %v1029_v23 = vpop.f32.mrf.mxu0 }
  0xcb   :  { %v1327_v28 = vadd.f32 %v1029_v23, %v876_v24 }
  0xcc   :  { %v112_v25 = vpop.f32.mrf.mxu0 }
  0xcd   :  { %v1329_v29 = vadd.f32 %v876_v24, %v112_v25  ;;  %v1335_v36 = vmax.f32 %v1327_v28, 0.0 }
  0xce   :  { %v1030_v30 = vpop.f32.mrf.mxu0 }
  0xcf   :  { %v1331_v31 = vadd.f32 %v1030_v30, %v876_v24  ;;  %v1338_v37 = vmax.f32 %v1329_v29, 0.0  ;;  %v194_v44 = vrot.slane %v1335_v36, 6  ;;  %v217_v45 = vrot.slane %v1335_v36, 2 }
  0xd0   :  { %v115_v33 = vpop.f32.mrf.mxu0 }
  0xd1   :  { %v1341_v38 = vmax.f32 %v1331_v31, 0.0  ;;  %v1343_v39 = vadd.f32 %v876_v24, %v115_v33  ;;  %v192_v46 = vrot.slane %v1338_v37, 6  ;;  %v215_v48 = vrot.slane %v1338_v37, 2 }
  0xd3   :  { %v195_v40 = vrot.slane %v1341_v38, 6  ;;  %v128_v41 = vmax.f32 %v1343_v39, 0.0  ;;  %v239_v51 = vpack.c.bf16 %v1341_v38, %v1335_v36  ;;  %v218_v7 = vrot.slane %v1341_v38, 2 }
  0xd5   :  { %v193_v47 = vrot.slane %v128_v41, 6  ;;  %v216_v49 = vrot.slane %v128_v41, 2  ;;  %v238_v50 = vpack.c.bf16 %v128_v41, %v1338_v37  ;;  %v197_v53 = vsel %vm196_vm2, %v194_v44, %v195_v40 }
  0xd6   :  { %v200_v56 = vsel %vm196_vm2, %v195_v40, %v192_v46  ;;  %v220_v8 = vsel %vm219_vm3, %v217_v45, %v218_v7  ;;  %v223_v9 = vsel %vm219_vm3, %v218_v7, %v215_v48  ;;  %v951_v40 = vld [vmem:[%s1485_s4] ss:$0 sm:$0xff] }
  0xd7   :  { %v198_v54 = vsel %vm196_vm2, %v193_v47, %v194_v44  ;;  %v199_v55 = vsel %vm196_vm2, %v192_v46, %v193_v47  ;;  %1047 = vmatprep.mubr.bf16.mxu1 %v238_v50  ;;  %v221_v58 = vsel %vm219_vm3, %v216_v49, %v217_v45  ;;  %v222_v59 = vsel %vm219_vm3, %v215_v48, %v216_v49 }
  0xd8   :  { %v916_v57 = vpack.c.bf16 %v199_v55, %v200_v56  ;;  %v919_v60 = vpack.c.bf16 %v197_v53, %v198_v54  ;;  %1048 = vmatmul.mubr.bf16.vlgmr.msra.gmra.mxu1 %v239_v51  ;;  %v946_v62 = vpack.c.bf16 %v221_v58, %v222_v59  ;;  %v949_v10 = vpack.c.bf16 %v223_v9, %v220_v8  ;;  %v1171_v54 = vld [vmem:[%s1488_s7 + $0x38] sm:$0xff]   ;;  %v1172_v56 = vld [vmem:[%s1488_s7 + $0x30] sm:$0xff]   ;;  %v1174_v58 = vld [vmem:[%s1488_s7 + $0x20] sm:$0xff]  }
  0xd9   :  { %1072 = vmatpush3.bf16.msra.mxu1 %v1155_v20  ;;  %v1202_v55 = vmov 0.0   ;;  %v1175_v59 = vld [vmem:[%s1488_s7 + $0x18] sm:$0xff]  }
  0xda   :  { %1067 = vmatprep.mubr.msk.bf16.mxu0 %vm1365_vm7, %v916_v57  ;;  %1087 = vmatprep.mubr.msk.bf16.mxu1 %vm945_vm8, %v946_v62  ;;  %v1173_v57 = vld [vmem:[%s1488_s7 + $0x28] sm:$0xff]   ;;  %v1178_v62 = vld [vmem:[%s1488_s7] sm:$0xff]  }
  0xdb   :  { %1068 = vmatmul.mubr.msk.bf16.vlgmr.msra.gmra.mxu0 %vm918_vm9, %v919_v60  ;;  %1073 = vmatprep.subr.bf16.mxu1 %v1156_v61  ;;  %v1176_v60 = vld [vmem:[%s1488_s7 + $0x10] sm:$0xff]  }
  0xdc   :  { %1092 = vmatpush3.bf16.msra.mxu0 %v1163_v11 }
  0xdd   :  { %1074 = vmatpush3.bf16.msra.mxu1 %v1156_v61  ;;  %1093 = vmatprep.subr.bf16.mxu0 %v1164_v12  ;;  %v1177_v61 = vld [vmem:[%s1488_s7 + $0x8] sm:$0xff]  }
  0xde   :  { %1075 = vmatprep.subr.bf16.mxu1 %v1157_v63 }
  0xe0   :  { %1094 = vmatpush3.bf16.msra.mxu0 %v1164_v12 }
  0xe1   :  { %1076 = vmatpush3.bf16.msra.mxu1 %v1157_v63  ;;  %1095 = vmatprep.subr.bf16.mxu0 %v1165_v13 }
  0xe2   :  { %1077 = vmatprep.subr.bf16.mxu1 %v1158_v0 }
  0xe4   :  { %1096 = vmatpush3.bf16.msra.mxu0 %v1165_v13 }
  0xe5   :  { %1078 = vmatpush3.bf16.msra.mxu1 %v1158_v0  ;;  %1097 = vmatprep.subr.bf16.mxu0 %v1166_v14  ;;  %v952_v0 = vld [vmem:[%s1487_s6] ss:$0 sm:$0xff] }
  0xe6   :  { %1079 = vmatprep.subr.bf16.mxu1 %v1159_v1 }
  0xe8   :  { %1098 = vmatpush3.bf16.msra.mxu0 %v1166_v14 }
  0xe9   :  { %1080 = vmatpush3.bf16.msra.mxu1 %v1159_v1  ;;  %1099 = vmatprep.subr.bf16.mxu0 %v1167_v15 }
  0xea   :  { %1081 = vmatprep.subr.bf16.mxu1 %v1160_v2 }
  0xec   :  { %1100 = vmatpush3.bf16.msra.mxu0 %v1167_v15 }
  0xed   :  { %1082 = vmatpush3.bf16.msra.mxu1 %v1160_v2  ;;  %1101 = vmatprep.subr.bf16.mxu0 %v1168_v16 }
  0xee   :  { %1083 = vmatprep.subr.bf16.mxu1 %v1161_v3 }
  0xf0   :  { %1102 = vmatpush3.bf16.msra.mxu0 %v1168_v16 }
  0xf1   :  { %1084 = vmatpush3.bf16.msra.mxu1 %v1161_v3  ;;  %1103 = vmatprep.subr.bf16.mxu0 %v1169_v17 }
  0xf2   :  { %1085 = vmatprep.subr.bf16.mxu1 %v1162_v5 }
  0xf4   :  { %1104 = vmatpush3.bf16.msra.mxu0 %v1169_v17 }
  0xf5   :  { %1086 = vmatpush3.bf16.msra.mxu1 %v1162_v5  ;;  %1105 = vmatprep.subr.bf16.mxu0 %v1170_v18 }
  0xf6   :  { %1111 = vmatprep.subr.bf16.mxu1 %v1202_v55 }
  0xf8   :  { %1088 = vmatmul.mubr.msk.bf16.vlgmr.msra.gmra.mxu1 %vm948_vm11, %v949_v10  ;;  %1106 = vmatpush3.bf16.msra.mxu0 %v1170_v18 }
  0xf9   :  { %1112 = vmatpush3.bf16.msra.mxu1 %v1171_v54  ;;  %1127 = vmatprep.mubr.msk.bf16.mxu1 %vm1203_vm12, %v1202_v55 }
  0xfa   :  { %1113 = vmatprep.subr.bf16.mxu1 %v1202_v55 }
  0xfd   :  { %1114 = vmatpush3.bf16.msra.mxu1 %v1172_v56 }
  0xfe   :  { %1115 = vmatprep.subr.bf16.mxu1 %v1202_v55 }
 0x101   :  { %1116 = vmatpush3.bf16.msra.mxu1 %v1173_v57 }
 0x102   :  { %1117 = vmatprep.subr.bf16.mxu1 %v1202_v55 }
 0x105   :  { %1118 = vmatpush3.bf16.msra.mxu1 %v1174_v58 }
 0x106   :  { %1119 = vmatprep.subr.bf16.mxu1 %v1202_v55 }
 0x109   :  { %1120 = vmatpush3.bf16.msra.mxu1 %v1175_v59 }
 0x10a   :  { %1121 = vmatprep.subr.bf16.mxu1 %v1202_v55 }
 0x10d   :  { %1122 = vmatpush3.bf16.msra.mxu1 %v1176_v60 }
 0x10e   :  { %1123 = vmatprep.subr.bf16.mxu1 %v1202_v55 }
 0x111   :  { %1124 = vmatpush3.bf16.msra.mxu1 %v1177_v61 }
 0x112   :  { %1125 = vmatprep.subr.bf16.mxu1 %v1202_v55 }
 0x115   :  { %1126 = vmatpush3.bf16.msra.mxu1 %v1178_v62 }
 0x198   :  { %v1049_v19 = vpop.f32.mrf.mxu1 }
 0x19a   :  { %v355_v20 = vpop.f32.mrf.mxu1 }
 0x19b   :  { %v1069_v21 = vpop.f32.mrf.mxu0 }
 0x19c   :  { %v1050_v22 = vpop.f32.mrf.mxu1  ;;  %v461_v30 = vadd.f32 %v1069_v21, %v1049_v19 }
 0x19d   :  { %v452_v23 = vpop.f32.mrf.mxu0 }
 0x19e   :  { %v358_v24 = vpop.f32.mrf.mxu1  ;;  %v453_v27 = vadd.f32 %v452_v23, %v355_v20 }
 0x19f   :  { %v1070_v25 = vpop.f32.mrf.mxu0 }
 0x1a0   :  { %v464_v34 = vadd.f32 %v1070_v25, %v1050_v22 }
 0x1a1   :  { %v455_v32 = vpop.f32.mrf.mxu0 }
 0x1a2   :  { %v456_v38 = vadd.f32 %v455_v32, %v358_v24 }
 0x1b8   :  { %v1089_v26 = vpop.f32.mrf.mxu1 }
 0x1b9   :  { %v583_v36 = vadd.f32 %v1089_v26, %v461_v30  ;;  %v961_v30 = vld [vmem:[%s1489_s8] ss:$0 sm:$0xff] }
 0x1ba   :  { %v566_v33 = vpop.f32.mrf.mxu1 }
 0x1bb   :  { %v581_v35 = vadd.f32 %v566_v33, %v453_v27  ;;  %v594_v46 = vadd.f32 %v951_v40, %v583_v36 }
 0x1bc   :  { %v1090_v37 = vpop.f32.mrf.mxu1 }
 0x1bd   :  { %v584_v41 = vadd.f32 %v1090_v37, %v464_v34  ;;  %v592_v43 = vadd.f32 %v951_v40, %v581_v35  ;;  %v598_v51 = vmax.f32 %v594_v46, 0.0 }
 0x1be   :  { %v569_v42 = vpop.f32.mrf.mxu1 }
 0x1bf   :  { %v595_v44 = vadd.f32 %v951_v40, %v584_v41  ;;  %v582_v45 = vadd.f32 %v569_v42, %v456_v38  ;;  %v596_v49 = vmax.f32 %v592_v43, 0.0 }
 0x1c1   :  { %v593_v47 = vadd.f32 %v951_v40, %v582_v45  ;;  %v599_v48 = vmax.f32 %v595_v44, 0.0 }
 0x1c3   :  { %v597_v50 = vmax.f32 %v593_v47, 0.0  ;;  %v601_v53 = vpack.c.bf16 %v599_v48, %v598_v51 }
 0x1c5   :  { %v600_v52 = vpack.c.bf16 %v597_v50, %v596_v49 }
 0x1c7   :  { %1107 = vmatprep.mubr.bf16.mxu0 %v600_v52 }
 0x1c8   :  { %1108 = vmatmul.mubr.bf16.vlgmr.msra.gmra.mxu0 %v601_v53 }
 0x288   :  { %v1109_v63 = vpop.f32.mrf.mxu0 }
 0x289   :  { %v716_v2 = vadd.f32 %v1109_v63, %v952_v0 }
 0x28a   :  { %v707_v1 = vpop.f32.mrf.mxu0 }
 0x28b   :  { %v708_v4 = vadd.f32 %v952_v0, %v707_v1  ;;  %v724_v7 = vadd.f32 %v716_v2, %v1327_v28 }
 0x28c   :  { %v1110_v3 = vpop.f32.mrf.mxu0 }
 0x28d   :  { %v719_v5 = vadd.f32 %v1110_v3, %v952_v0  ;;  %v722_v10 = vadd.f32 %v708_v4, %v1329_v29 }
 0x28e   :  { %v710_v6 = vpop.f32.mrf.mxu0 }
 0x28f   :  { %v725_v8 = vadd.f32 %v719_v5, %v1331_v31  ;;  %v711_v9 = vadd.f32 %v952_v0, %v710_v6 }
 0x291   :  { %v733_v11 = vmax.f32 %v724_v7, %v725_v8  ;;  %v723_v12 = vadd.f32 %v711_v9, %v1343_v39 }
 0x293   :  { %v734_v13 = vrot.slane %v733_v11, 4  ;;  %v726_v14 = vmax.f32 %v722_v10, %v723_v12 }
 0x295   :  { %v735_v15 = vmax.f32 %v733_v11, %v734_v13  ;;  %v727_v16 = vrot.slane %v726_v14, 4 }
 0x297   :  { %v736_v17 = vrot.slane %v735_v15, 2  ;;  %v728_v18 = vmax.f32 %v726_v14, %v727_v16 }
 0x299   :  { %v737_v19 = vmax.f32 %v735_v15, %v736_v17  ;;  %v729_v20 = vrot.slane %v728_v18, 2 }
 0x29b   :  { %v738_v21 = vrot.slane %v737_v19, 1  ;;  %v730_v22 = vmax.f32 %v728_v18, %v729_v20 }
 0x29d   :  { %v739_v23 = vmax.f32 %v737_v19, %v738_v21  ;;  %v731_v28 = vrot.slane %v730_v22, 1 }
 0x29f   :  { %v741_v24 = vpack.c.bf16 %v739_v23, %v739_v23  ;;  %v732_v31 = vmax.f32 %v730_v22, %v731_v28 }
 0x2a1   :  { %v740_v25 = vpack.c.bf16 %v732_v31, %v732_v31  ;;  %v768_v29 = vunpack.c.l.b16 %v741_v24 }
 0x2a3   :  { %v767_v26 = vunpack.c.l.b16 %v740_v25 }
 0x2a5   :  { %v770_v27 = vsel %vm769_vm13, %v768_v29, %v767_v26 }
 0x2a6   :  { %v771_v39 = vpack.c.b16 %v770_v27, %v770_v27 }
 0x2a8   :  { %1128 = vmatmul.mubr.bf16.vlgmr.msra.gmra.mxu1 %v771_v39 }
 0x368   :  { %v855_v32 = vpop.f32.mrf.mxu1 }
 0x369   :  { %v856_v33 = vadd.f32 %v961_v30, %v855_v32 }
 0x36a   :  { %v1129_v34 = vpop.f32.mrf.mxu1 }
 0x36b   :  { %861 = vst [vmem:[#allocation2] sm:$0x3] %v856_v33 }
 0x36c   :  { %v858_v35 = vpop.f32.mrf.mxu1 }
 0x36d   :  { %1190 = shalt.err (!%p1187_p4)
}
 0x36e   :  { %871 = dma.vmem_to_hbm [thread:$0]  %s869_s27, 32, %s1490_s9, [#allocation3]   ;;  %v1130_v36 = vpop.f32.mrf.mxu1 }
 0x36f   :  { %1199 = dma.done.wait [#allocation3], 32  }
 0x370   :  { %1200 = vsyncadd [#allocation3], 4294967264 }
 0x371   :  { %875 = vsyncpa [#allocation3], 1 }

</bundles_post_ra>
